<compile_context>
chip_gen: v7x
topology: tpu7x:2x2x1
jax: 0.10.0
libtpu: 0.0.40
codegen_flags: <defaults>
</compile_context>

<pallas_src>
import math

import jax
import jax.numpy as jnp
from jax.experimental import pallas as pl
from jax.experimental.pallas import tpu as pltpu


def _round_up(x, m):
    return ((x + m - 1) // m) * m


def _ffn_kernel(x_ref, gamma_ref, beta_ref, wi_ref, wo_ref, o_ref,
                acc_ref, xn_ref):
    # Per grid step (i = row tile, k = d_hid slice):
    #   x_ref:     (tm, d_in)      input row tile (same block for every k)
    #   gamma_ref: (1, d_in)       LayerNorm weight
    #   beta_ref:  (1, d_in)       LayerNorm bias
    #   wi_ref:    (tk, d_in)      k-th row-slice of Wi   (PyTorch layout)
    #   wo_ref:    (d_in, tk)      k-th col-slice of Wo   (PyTorch layout)
    #   o_ref:     (tm, d_in)      output row tile (written at last k)
    #   acc_ref:   (tm, d_in) f32  partial Wo-output accumulator (scratch)
    #   xn_ref:    (tm, d_in)      cached LayerNorm(x) in matmul dtype (scratch)
    k = pl.program_id(1)

    @pl.when(k == 0)
    def _():
        # LayerNorm over features in f32, once per row tile; eps = 1e-6.
        xf = x_ref[...].astype(jnp.float32)
        mu = jnp.mean(xf, axis=-1, keepdims=True)
        var = jnp.mean((xf - mu) * (xf - mu), axis=-1, keepdims=True)
        xn = (xf - mu) * jax.lax.rsqrt(var + 1e-6)
        xn = xn * gamma_ref[...].astype(jnp.float32) \
                + beta_ref[...].astype(jnp.float32)
        xn_ref[...] = xn.astype(xn_ref.dtype)
        acc_ref[...] = jnp.zeros_like(acc_ref)

    # h_k = LayerNorm(x) @ Wi[k].T  (contract feature axes; f32 accumulation).
    h = jax.lax.dot_general(
        xn_ref[...], wi_ref[...],
        dimension_numbers=(((1,), (1,)), ((), ())),
        preferred_element_type=jnp.float32)

    # Exact (erf-based) GELU — matches torch.nn.functional.gelu default.
    h = 0.5 * h * (1.0 + jax.lax.erf(h * (1.0 / math.sqrt(2.0))))
    h = h.astype(wo_ref.dtype)

    # acc += h_k @ Wo[:, k].T   (partial contraction over this d_hid slice).
    acc_ref[...] += jax.lax.dot_general(
        h, wo_ref[...],
        dimension_numbers=(((1,), (1,)), ((), ())),
        preferred_element_type=jnp.float32)

    @pl.when(k == pl.num_programs(1) - 1)
    def _():
        # Residual add in f32, single downcast on store.
        o_ref[...] = (x_ref[...].astype(jnp.float32)
                      + acc_ref[...]).astype(o_ref.dtype)


def positionwise_feed_forward(x, gamma, beta, wi, wo, *, tm=256, tk=512):
    """x: (B, S, d_in).  wi: (d_hid, d_in), wo: (d_in, d_hid) — PyTorch layouts."""
    B, S, d_in = x.shape
    d_hid = wi.shape[0]
    M = B * S

    # Matmul operands go to the MXU in the weight dtype (bf16 native path when
    # the weights are bf16); accumulation is always f32.
    compute_dtype = wi.dtype

    # Row tile: sublane-multiple for the input dtype, clipped to the row count.
    sub = 8 if x.dtype == jnp.float32 else 16
    tm_eff = max(sub, min(tm, _round_up(M, sub)))
    tm_eff = _round_up(tm_eff, sub)
    M_pad = _round_up(M, tm_eff)

    # d_hid (reduction) tile: whole hidden dim if it fits the budget, otherwise
    # a 128-multiple slice so the Wo slice's lane dim stays aligned.
    if tk >= d_hid:
        tk_eff = d_hid
    else:
        tk_eff = max(128, (tk // 128) * 128)
    d_hid_pad = _round_up(d_hid, tk_eff)
    n_k = d_hid_pad // tk_eff

    x2d = x.reshape(M, d_in)
    if M_pad != M:
        x2d = jnp.pad(x2d, ((0, M_pad - M), (0, 0)))
    wi_p, wo_p = wi, wo
    if d_hid_pad != d_hid:
        # Zero-padded hidden units: gelu(0)=0 through zero Wo columns => no-op.
        wi_p = jnp.pad(wi, ((0, d_hid_pad - d_hid), (0, 0)))
        wo_p = jnp.pad(wo, ((0, 0), (0, d_hid_pad - d_hid)))

    gamma2d = gamma.reshape(1, d_in)
    beta2d = beta.reshape(1, d_in)

    # Per-step VMEM budget (double-buffered ins/outs + scratch) so large d_hid
    # slices are not silently capped by the default scoped-VMEM limit.
    w_item = jnp.dtype(wi_p.dtype).itemsize
    in_bytes = 2 * (tm_eff * d_in * x2d.dtype.itemsize
                    + 2 * tk_eff * d_in * w_item
                    + 2 * d_in * jnp.dtype(gamma2d.dtype).itemsize)
    out_bytes = 2 * tm_eff * d_in * jnp.dtype(x.dtype).itemsize
    scratch_bytes = tm_eff * d_in * (4 + jnp.dtype(compute_dtype).itemsize)
    vmem_limit = int(max(in_bytes + out_bytes + scratch_bytes + (4 << 20),
                         32 * 1024 * 1024))

    cost = pl.CostEstimate(
        flops=4 * M * d_in * d_hid,
        transcendentals=M * d_hid,
        bytes_accessed=(x.size + wi.size + wo.size + gamma.size + beta.size
                        + M * d_in) * jnp.dtype(x.dtype).itemsize)

    # NOTE: for real configs d_in should be a multiple of 128 (lane-dense
    # stores); in this toy config the (tm, d_in) block is full-extent on d_in.
    out2d = pl.pallas_call(
        _ffn_kernel,
        out_shape=jax.ShapeDtypeStruct((M_pad, d_in), x.dtype),
        grid_spec=pltpu.PrefetchScalarGridSpec(
            num_scalar_prefetch=0,
            grid=(M_pad // tm_eff, n_k),
            in_specs=[
                pl.BlockSpec((tm_eff, d_in), lambda i, k: (i, 0)),   # x row tile
                pl.BlockSpec((1, d_in), lambda i, k: (0, 0)),        # gamma
                pl.BlockSpec((1, d_in), lambda i, k: (0, 0)),        # beta
                pl.BlockSpec((tk_eff, d_in), lambda i, k: (k, 0)),   # Wi k-slice
                pl.BlockSpec((d_in, tk_eff), lambda i, k: (0, k)),   # Wo k-slice
            ],
            out_specs=pl.BlockSpec((tm_eff, d_in), lambda i, k: (i, 0)),
            scratch_shapes=[
                pltpu.VMEM((tm_eff, d_in), jnp.float32),     # Wo-output accumulator
                pltpu.VMEM((tm_eff, d_in), compute_dtype),   # cached LayerNorm(x)
            ],
        ),
        compiler_params=pltpu.CompilerParams(
            dimension_semantics=("parallel", "arbitrary"),
            vmem_limit_bytes=vmem_limit),
        cost_estimate=cost,
    )(x2d, gamma2d, beta2d, wi_p, wo_p)

    return out2d[:M].reshape(B, S, d_in)


if __name__ == "__main__":
    # Small deterministic setup consistent with the module:
    # d_in = 32, d_hid = 64, batch = 2, seq = 8.
    B, S, d_in, d_hid = 2, 8, 32, 64

    key = jax.random.PRNGKey(0)
    kx, kwi, kwo, kg, kb = jax.random.split(key, 5)

    x = jax.random.normal(kx, (B, S, d_in), dtype=jnp.float32)

    wi = jax.random.uniform(kwi, (d_hid, d_in), dtype=jnp.float32,
                            minval=-1.0, maxval=1.0) / math.sqrt(d_in)
    wo = jax.random.uniform(kwo, (d_in, d_hid), dtype=jnp.float32,
                            minval=-1.0, maxval=1.0) / math.sqrt(d_hid)
    gamma = 1.0 + 0.1 * jax.random.normal(kg, (d_in,), dtype=jnp.float32)
    beta = 0.1 * jax.random.normal(kb, (d_in,), dtype=jnp.float32)

    out = positionwise_feed_forward(x, gamma, beta, wi, wo)
    out = jax.block_until_ready(out)

    # Pure-JAX reference (dropout is identity in eval).
    mu = jnp.mean(x, axis=-1, keepdims=True)
    var = jnp.mean((x - mu) ** 2, axis=-1, keepdims=True)
    xn = (x - mu) * jax.lax.rsqrt(var + 1e-6) * gamma + beta
    h = xn @ wi.T
    h = 0.5 * h * (1.0 + jax.lax.erf(h / math.sqrt(2.0)))
    ref = x + h @ wo.T
    assert jnp.allclose(out, ref, atol=1e-5, rtol=1e-5), "mismatch vs reference"

    print("KERNEL_OK")
</pallas_src>

<mosaic_0001>
module attributes {stable_mosaic.version = 11 : i64} {
  func.func @_ffn_kernel(%arg0: i32, %arg1: i32, %arg2: memref<16x32xf32, #tpu.memory_space<vmem>>, %arg3: memref<1x32xf32, #tpu.memory_space<vmem>>, %arg4: memref<1x32xf32, #tpu.memory_space<vmem>>, %arg5: memref<64x32xf32, #tpu.memory_space<vmem>>, %arg6: memref<32x64xf32, #tpu.memory_space<vmem>>, %arg7: memref<16x32xf32, #tpu.memory_space<vmem>>, %arg8: memref<16x32xf32, #tpu.memory_space<vmem>>, %arg9: memref<16x32xf32, #tpu.memory_space<vmem>>) attributes {dimension_semantics = [#tpu.dimension_semantics<parallel>, #tpu.dimension_semantics<arbitrary>], iteration_bounds = array<i64: 1, 1>, scalar_prefetch = 0 : i64, scratch_operands = 2 : i64, tpu.core_type = #tpu.core_type<tc>, window_params = [{transform_indices = @transform_0, window_bounds = array<i64: 16, 32>}, {pipeline_mode = #tpu.pipeline_mode<synchronous>, transform_indices = @transform_1, window_bounds = array<i64: 1, 32>}, {pipeline_mode = #tpu.pipeline_mode<synchronous>, transform_indices = @transform_2, window_bounds = array<i64: 1, 32>}, {transform_indices = @transform_3, window_bounds = array<i64: 64, 32>}, {transform_indices = @transform_4, window_bounds = array<i64: 32, 64>}, {transform_indices = @transform_5, window_bounds = array<i64: 16, 32>}]} {
    %c0_i32 = arith.constant 0 : i32
    %0 = arith.cmpi eq, %arg1, %c0_i32 : i32
    %1 = arith.extui %0 : i1 to i32
    %c0_i32_0 = arith.constant 0 : i32
    %2 = arith.cmpi ne, %1, %c0_i32_0 : i32
    scf.if %2 {
      %c0_16 = arith.constant 0 : index
      %c0_17 = arith.constant 0 : index
      %22 = vector.load %arg2[%c0_16, %c0_17] : memref<16x32xf32, #tpu.memory_space<vmem>>, vector<16x32xf32>
      %cst_18 = arith.constant dense<0.000000e+00> : vector<16xf32>
      %23 = vector.multi_reduction <add>, %22, %cst_18 [1] : vector<16x32xf32> to vector<16xf32>
      %24 = vector.shape_cast %23 : vector<16xf32> to vector<16x1xf32>
      %cst_19 = arith.constant 3.200000e+01 : f32
      %25 = vector.broadcast %cst_19 : f32 to vector<16x1xf32>
      %26 = arith.divf %24, %25 : vector<16x1xf32>
      %27 = vector.broadcast %26 : vector<16x1xf32> to vector<16x32xf32>
      %28 = arith.subf %22, %27 : vector<16x32xf32>
      %29 = vector.broadcast %26 : vector<16x1xf32> to vector<16x32xf32>
      %30 = arith.subf %22, %29 : vector<16x32xf32>
      %31 = arith.mulf %28, %30 : vector<16x32xf32>
      %cst_20 = arith.constant dense<0.000000e+00> : vector<16xf32>
      %32 = vector.multi_reduction <add>, %31, %cst_20 [1] : vector<16x32xf32> to vector<16xf32>
      %33 = vector.shape_cast %32 : vector<16xf32> to vector<16x1xf32>
      %cst_21 = arith.constant 3.200000e+01 : f32
      %34 = vector.broadcast %cst_21 : f32 to vector<16x1xf32>
      %35 = arith.divf %33, %34 : vector<16x1xf32>
      %36 = vector.broadcast %26 : vector<16x1xf32> to vector<16x32xf32>
      %37 = arith.subf %22, %36 : vector<16x32xf32>
      %cst_22 = arith.constant 9.99999997E-7 : f32
      %38 = vector.broadcast %cst_22 : f32 to vector<16x1xf32>
      %39 = arith.addf %35, %38 : vector<16x1xf32>
      %40 = math.rsqrt %39 : vector<16x1xf32>
      %41 = vector.broadcast %40 : vector<16x1xf32> to vector<16x32xf32>
      %42 = arith.mulf %37, %41 : vector<16x32xf32>
      %c0_23 = arith.constant 0 : index
      %c0_24 = arith.constant 0 : index
      %43 = vector.load %arg3[%c0_23, %c0_24] : memref<1x32xf32, #tpu.memory_space<vmem>>, vector<1x32xf32>
      %44 = vector.broadcast %43 : vector<1x32xf32> to vector<16x32xf32>
      %45 = arith.mulf %42, %44 : vector<16x32xf32>
      %c0_25 = arith.constant 0 : index
      %c0_26 = arith.constant 0 : index
      %46 = vector.load %arg4[%c0_25, %c0_26] : memref<1x32xf32, #tpu.memory_space<vmem>>, vector<1x32xf32>
      %47 = vector.broadcast %46 : vector<1x32xf32> to vector<16x32xf32>
      %48 = arith.addf %45, %47 : vector<16x32xf32>
      %c0_27 = arith.constant 0 : index
      %c0_28 = arith.constant 0 : index
      %49 = vector.load %arg9[%c0_27, %c0_28] : memref<16x32xf32, #tpu.memory_space<vmem>>, vector<16x32xf32>
      tpu.vector_store %arg9[%c0_27, %c0_28], %48 {strides = array<i32>} : memref<16x32xf32, #tpu.memory_space<vmem>>, vector<16x32xf32>,
      %cst_29 = arith.constant 0.000000e+00 : f32
      %50 = vector.broadcast %cst_29 : f32 to vector<16x32xf32>
      %c0_30 = arith.constant 0 : index
      %c0_31 = arith.constant 0 : index
      %51 = vector.load %arg8[%c0_30, %c0_31] : memref<16x32xf32, #tpu.memory_space<vmem>>, vector<16x32xf32>
      tpu.vector_store %arg8[%c0_30, %c0_31], %50 {strides = array<i32>} : memref<16x32xf32, #tpu.memory_space<vmem>>, vector<16x32xf32>,
    } else {
    }
    %c0 = arith.constant 0 : index
    %c0_1 = arith.constant 0 : index
    %3 = vector.load %arg9[%c0, %c0_1] : memref<16x32xf32, #tpu.memory_space<vmem>>, vector<16x32xf32>
    %c0_2 = arith.constant 0 : index
    %c0_3 = arith.constant 0 : index
    %4 = vector.load %arg5[%c0_2, %c0_3] : memref<64x32xf32, #tpu.memory_space<vmem>>, vector<64x32xf32>
    %cst = arith.constant dense<0.000000e+00> : vector<16x64xf32>
    %5 = tpu.matmul %3, %4, %cst {dimension_numbers = #tpu.dot_dimension_numbers<[1], [1], [0], [0], [0, 0, 1, 0], [], []>} : vector<16x32xf32>, vector<64x32xf32>, vector<16x64xf32> -> vector<16x64xf32>
    %cst_4 = arith.constant 5.000000e-01 : f32
    %6 = vector.broadcast %cst_4 : f32 to vector<16x64xf32>
    %7 = arith.mulf %6, %5 : vector<16x64xf32>
    %cst_5 = arith.constant 0.707106769 : f32
    %8 = vector.broadcast %cst_5 : f32 to vector<16x64xf32>
    %9 = arith.mulf %5, %8 : vector<16x64xf32>
    %10 = math.erf %9 : vector<16x64xf32>
    %cst_6 = arith.constant 1.000000e+00 : f32
    %11 = vector.broadcast %cst_6 : f32 to vector<16x64xf32>
    %12 = arith.addf %11, %10 : vector<16x64xf32>
    %13 = arith.mulf %7, %12 : vector<16x64xf32>
    %c0_7 = arith.constant 0 : index
    %c0_8 = arith.constant 0 : index
    %14 = vector.load %arg8[%c0_7, %c0_8] : memref<16x32xf32, #tpu.memory_space<vmem>>, vector<16x32xf32>
    %c0_9 = arith.constant 0 : index
    %c0_10 = arith.constant 0 : index
    %15 = vector.load %arg6[%c0_9, %c0_10] : memref<32x64xf32, #tpu.memory_space<vmem>>, vector<32x64xf32>
    %cst_11 = arith.constant dense<0.000000e+00> : vector<16x32xf32>
    %16 = tpu.matmul %13, %15, %cst_11 {dimension_numbers = #tpu.dot_dimension_numbers<[1], [1], [0], [0], [0, 0, 1, 0], [], []>} : vector<16x64xf32>, vector<32x64xf32>, vector<16x32xf32> -> vector<16x32xf32>
    %17 = arith.addf %14, %16 : vector<16x32xf32>
    %c0_12 = arith.constant 0 : index
    %c0_13 = arith.constant 0 : index
    %18 = vector.load %arg8[%c0_12, %c0_13] : memref<16x32xf32, #tpu.memory_space<vmem>>, vector<16x32xf32>
    tpu.vector_store %arg8[%c0_12, %c0_13], %17 {strides = array<i32>} : memref<16x32xf32, #tpu.memory_space<vmem>>, vector<16x32xf32>,
    %c0_i32_14 = arith.constant 0 : i32
    %19 = arith.cmpi eq, %arg1, %c0_i32_14 : i32
    %20 = arith.extui %19 : i1 to i32
    %c0_i32_15 = arith.constant 0 : i32
    %21 = arith.cmpi ne, %20, %c0_i32_15 : i32
    scf.if %21 {
      %c0_16 = arith.constant 0 : index
      %c0_17 = arith.constant 0 : index
      %22 = vector.load %arg2[%c0_16, %c0_17] : memref<16x32xf32, #tpu.memory_space<vmem>>, vector<16x32xf32>
      %c0_18 = arith.constant 0 : index
      %c0_19 = arith.constant 0 : index
      %23 = vector.load %arg8[%c0_18, %c0_19] : memref<16x32xf32, #tpu.memory_space<vmem>>, vector<16x32xf32>
      %24 = arith.addf %22, %23 : vector<16x32xf32>
      %c0_20 = arith.constant 0 : index
      %c0_21 = arith.constant 0 : index
      %25 = vector.load %arg7[%c0_20, %c0_21] : memref<16x32xf32, #tpu.memory_space<vmem>>, vector<16x32xf32>
      tpu.vector_store %arg7[%c0_20, %c0_21], %24 {strides = array<i32>} : memref<16x32xf32, #tpu.memory_space<vmem>>, vector<16x32xf32>,
    } else {
    }
    return
  }
  func.func @transform_0(%arg0: i32, %arg1: i32) -> (i32, i32) {
    %c0_i32 = arith.constant 0 : i32
    %c0_i32_0 = arith.constant 0 : i32
    return %arg0, %c0_i32 : i32, i32
  }
  func.func @transform_1(%arg0: i32, %arg1: i32) -> (i32, i32) {
    %c0_i32 = arith.constant 0 : i32
    %c0_i32_0 = arith.constant 0 : i32
    %c0_i32_1 = arith.constant 0 : i32
    return %c0_i32, %c0_i32_0 : i32, i32
  }
  func.func @transform_2(%arg0: i32, %arg1: i32) -> (i32, i32) {
    %c0_i32 = arith.constant 0 : i32
    %c0_i32_0 = arith.constant 0 : i32
    %c0_i32_1 = arith.constant 0 : i32
    return %c0_i32, %c0_i32_0 : i32, i32
  }
  func.func @transform_3(%arg0: i32, %arg1: i32) -> (i32, i32) {
    %c0_i32 = arith.constant 0 : i32
    %c0_i32_0 = arith.constant 0 : i32
    return %arg1, %c0_i32 : i32, i32
  }
  func.func @transform_4(%arg0: i32, %arg1: i32) -> (i32, i32) {
    %c0_i32 = arith.constant 0 : i32
    %c0_i32_0 = arith.constant 0 : i32
    return %c0_i32, %arg1 : i32, i32
  }
  func.func @transform_5(%arg0: i32, %arg1: i32) -> (i32, i32) {
    %c0_i32 = arith.constant 0 : i32
    %c0_i32_0 = arith.constant 0 : i32
    return %arg0, %c0_i32 : i32, i32
  }
}

</mosaic_0001>

<bundles_post_ra>
// kernel: tpu_custom_call.1
= control target key start
LH: loop header
LB: loop body
LE: loop exit
PB: predicated region body
PF: predicated region fallthrough
CT: control target
= control target key end

     0   :  { %vm27_vm0 = vcmask 261120   ;;  %s614_s0 = inlined_call_operand.vmem [shape: f32[16,32], index: 0, kind: input, shape index: {}]   ;;  %s615_s1 = inlined_call_operand.vmem [shape: f32[1,32], index: 1, kind: input, shape index: {}]   ;;  %s616_s2 = inlined_call_operand.vmem [shape: f32[1,32], index: 2, kind: input, shape index: {}]   ;;  %s617_s3 = inlined_call_operand.vmem [shape: f32[64,32], index: 3, kind: input, shape index: {}]   ;;  %s618_s4 = inlined_call_operand.vmem [shape: f32[32,64], index: 4, kind: input, shape index: {}]   ;;  %s619_s5 = inlined_call_operand.hbm [shape: f32[16,32], index: 5, kind: output, shape index: {}]  }
   0x1   :  { %v507_v0 = vld [vmem:[%s614_s0] sm:$0xff]  ;;  %v512_v1 = vld [vmem:[%s614_s0 + $0x8] sm:$0xff] }
   0x2   :  { %10 = vsyncpa [#allocation5], 0  ;;  %v28_v2 = vsel %vm27_vm0, %v507_v0, 0.0  ;;  %v31_v3 = vsel %vm27_vm0, %v512_v1, 0.0  ;;  %v79_v14 = vld [vmem:[%s617_s3] sm:$0xff]  ;;  %v80_v15 = vld [vmem:[%s617_s3 + $0x8] sm:$0xff] }
   0x3   :  { %29 = vadd.xlane.f32.xlu0 %v28_v2  ;;  %v398_v16 = vpack.c.bf16 %v80_v15, %v79_v14  ;;  %vm530_vm1 = vmpackc.low %vm27_vm0, %vm27_vm0  ;;  %v81_v18 = vld [vmem:[%s617_s3 + $0x10] sm:$0xff]  ;;  %v82_v19 = vld [vmem:[%s617_s3 + $0x18] sm:$0xff]  ;;  %vm209_vm2 = vcmask 523264   ;;  %v470_v51 = vmov 0.0  }
   0x4   :  { %v404_v20 = vpack.c.bf16 %v82_v19, %v81_v18  ;;  %v83_v21 = vld [vmem:[%s617_s3 + $0x20] sm:$0xff]  ;;  %v84_v22 = vld [vmem:[%s617_s3 + $0x28] sm:$0xff]  ;;  %v85_v24 = vld [vmem:[%s617_s3 + $0x30] sm:$0xff]  ;;  %76 = vst.msk [vmem:[#allocation2 + $0x8] sm:$0xff] %vm27_vm0, %v470_v51 }
   0x5   :  { %400 = vmatprep.subr.msk.bf16.mxu0 %vm530_vm1, %v398_v16  ;;  %v410_v23 = vpack.c.bf16 %v84_v22, %v83_v21  ;;  %v86_v25 = vld [vmem:[%s617_s3 + $0x38] sm:$0xff]  ;;  %v334_v34 = vld [vmem:[%s615_s1] ss:$0 sm:$0xff]  ;;  %v206_v46 = vld [vmem:[%s618_s4 + $0x8] sm:$0xff]  ;;  %75 = vst.msk [vmem:[#allocation2] sm:$0xff] %vm27_vm0, %v470_v51 }
   0x6   :  { %403 = vmatpush3.bf16.xpose.msk.msra.mxu0 %vm530_vm1, %v398_v16  ;;  %v416_v26 = vpack.c.bf16 %v86_v25, %v85_v24  ;;  %v335_v36 = vld [vmem:[%s616_s2] ss:$0 sm:$0xff]  ;;  %vm423_vm3 = vmpackc.low %vm209_vm2, %vm209_vm2  ;;  %v207_v48 = vld [vmem:[%s618_s4 + $0x10] sm:$0xff] }
   0x7   :  { %32 = vadd.xlane.f32.xlu0 %v31_v3  ;;  %406 = vmatprep.subr.msk.bf16.mxu0 %vm530_vm1, %v404_v20  ;;  %v205_v45 = vld [vmem:[%s618_s4] sm:$0xff]  ;;  %v208_v49 = vld [vmem:[%s618_s4 + $0x18] sm:$0xff]  ;;  %s471_s4 = smov [#allocation4]  }
   0x8   :  { %v422_v47 = vpack.c.bf16 %v206_v46, %v205_v45  ;;  %v428_v50 = vpack.c.bf16 %v208_v49, %v207_v48  ;;  %s323_s21 = sshll.u32 %s471_s4, 4  ;;  %s324_s21 = int_to_ptr.vmem [resolvable:$true] %s323_s21 }
   0x9   :  { %s446_s0 = scalar_lea.vmem %s324_s21, 256  ;;  %p451_p1 = scmp.lt.s32.totalorder %s324_s21, %s324_s21 }
   0xa   :  { %424 = vmatprep.subr.msk.bf16.mxu1 %vm423_vm3, %v422_v47  ;;  %p447_p0 = scmp.ne.s32.totalorder %s324_s21, %s446_s0  ;;  %p452_p2 = scmp.lt.s32.totalorder %s446_s0, %s446_s0 }
   0xb   :  { %427 = vmatpush3.bf16.xpose.msk.msra.mxu1 %vm423_vm3, %v422_v47  ;;  %v204_v2 = vld [vmem:[#allocation2 + $0x8] sm:$0xff] }
   0xc   :  { %430 = vmatprep.subr.msk.bf16.mxu1 %vm423_vm3, %v428_v50  ;;  %v203_v3 = vld [vmem:[#allocation2] sm:$0xff]  ;;  %p453_p3 = por %p452_p2, %p451_p1 }
   0xe   :  { %409 = vmatpush3.bf16.xpose.msk.msra.mxu0 %vm530_vm1, %v404_v20  ;;  %p454_p4 = pnand %p453_p3, %p447_p0 }
   0xf   :  { %412 = vmatprep.subr.msk.bf16.mxu0 %vm530_vm1, %v410_v23 }
  0x13   :  { %433 = vmatpush3.bf16.xpose.msk.msra.mxu1 %vm423_vm3, %v428_v50 }
  0x16   :  { %415 = vmatpush3.bf16.xpose.msk.msra.mxu0 %vm530_vm1, %v410_v23 }
  0x17   :  { %418 = vmatprep.subr.msk.bf16.mxu0 %vm530_vm1, %v416_v26 }
  0x1e   :  { %421 = vmatpush3.bf16.xpose.msk.msra.mxu0 %vm530_vm1, %v416_v26 }
  0x90   :  { %v30_v4 = vpop.xlane.xlu0 %29 }
  0x91   :  { %v35_v5 = vmul.f32 0.03125, %v30_v4 }
  0x93   :  { %v37_v6 = vsub.f32 %v507_v0, %v35_v5 }
  0x94   :  { %v33_v7 = vpop.xlane.xlu0 %32 }
  0x95   :  { %v36_v8 = vmul.f32 0.03125, %v33_v7  ;;  %v39_v9 = vmul.f32 %v37_v6, %v37_v6 }
  0x97   :  { %v38_v10 = vsub.f32 %v512_v1, %v36_v8  ;;  %v41_v11 = vsel %vm27_vm0, %v39_v9, 0.0 }
  0x98   :  { %42 = vadd.xlane.f32.xlu1 %v41_v11 }
  0x99   :  { %v40_v12 = vmul.f32 %v38_v10, %v38_v10 }
  0x9b   :  { %v44_v13 = vsel %vm27_vm0, %v40_v12, 0.0 }
  0x9c   :  { %45 = vadd.xlane.f32.xlu1 %v44_v13 }
 0x125   :  { %v43_v27 = vpop.xlane.xlu1 %42 }
 0x126   :  { %v47_v28 = vmul.f32 0.03125, %v43_v27 }
 0x128   :  { %v49_v29 = vadd.f32 1e-06, %v47_v28 }
 0x129   :  { %v46_v30 = vpop.xlane.xlu1 %45 }
 0x12a   :  { %438 = vrsqrt.f32 %v49_v29  ;;  %v48_v31 = vmul.f32 0.03125, %v46_v30 }
 0x12c   :  { %v50_v32 = vadd.f32 1e-06, %v48_v31 }
 0x12e   :  { %440 = vrsqrt.f32 %v50_v32 }
 0x134   :  { %v439_v33 = vpop.eup %438 }
 0x135   :  { %v53_v35 = vmul.f32 %v439_v33, %v37_v6 }
 0x137   :  { %v62_v37 = vmul.f32 %v334_v34, %v53_v35 }
 0x138   :  { %v441_v38 = vpop.eup %440 }
 0x139   :  { %v71_v39 = vadd.f32 %v335_v36, %v62_v37  ;;  %v54_v40 = vmul.f32 %v441_v38, %v38_v10 }
 0x13b   :  { %73 = vst.msk [vmem:[#allocation3] sm:$0xff] %vm27_vm0, %v71_v39  ;;  %v63_v41 = vmul.f32 %v334_v34, %v54_v40 }
 0x13d   :  { %v72_v42 = vadd.f32 %v335_v36, %v63_v41 }
 0x13f   :  { %74 = vst.msk [vmem:[#allocation3 + $0x8] sm:$0xff] %vm27_vm0, %v72_v42 }
 0x142   :  { %v77_v43 = vld [vmem:[#allocation3] sm:$0xff] }
 0x143   :  { %384 = vmatprep.mubr.msk.f32.mxu0 %vm27_vm0, %v77_v43 }
 0x146   :  { %v78_v44 = vld [vmem:[#allocation3 + $0x8] sm:$0xff] }
 0x147   :  { %385 = vmatmul.mubr.msk.f32.vlgmr.msra.gmra.mrb[0].mxu0 %vm27_vm0, %v78_v44 }
 0x21a   :  { %v386_v52 = vpop.f32.mrb[0].mxu0 }
 0x21b   :  { %v196_v53 = vmul.f32 0.70710677, %v386_v52  ;;  %v184_v54 = vpop.f32.mrb[1].mxu0  ;;  %v194_v61 = vmul.f32 0.5, %v386_v52 }
 0x21c   :  { %v195_v55 = vmul.f32 0.70710677, %v184_v54  ;;  %v193_v59 = vmul.f32 0.5, %v184_v54 }
 0x21d   :  { %442 = verf.f32 %v196_v53 }
 0x21e   :  { %444 = verf.f32 %v195_v55 }
 0x227   :  { %v443_v56 = vpop.eup %442 }
 0x228   :  { %v445_v57 = vpop.eup %444  ;;  %v200_v58 = vadd.f32 1.0, %v443_v56 }
 0x229   :  { %v199_v60 = vadd.f32 1.0, %v445_v57 }
 0x22a   :  { %v202_v63 = vmul.f32 %v200_v58, %v194_v61 }
 0x22b   :  { %v201_v62 = vmul.f32 %v199_v60, %v193_v59 }
 0x22d   :  { %395 = vmatprep.mubr.msk.f32.mxu1 %vm209_vm2, %v201_v62 }
 0x22e   :  { %396 = vmatmul.mubr.msk.f32.vlgmr.msra.gmra.mrb[0].mxu1 %vm209_vm2, %v202_v63 }
 0x301   :  { %v397_v4 = vpop.f32.mrb[0].mxu1 }
 0x302   :  { %v304_v5 = vadd.f32 %v397_v4, %v204_v2  ;;  %v294_v6 = vpop.f32.mrb[1].mxu1 }
 0x303   :  { %v303_v7 = vadd.f32 %v294_v6, %v203_v3 }
 0x304   :  { %306 = vst.msk [vmem:[#allocation2 + $0x8] sm:$0xff] %vm27_vm0, %v304_v5 }
 0x305   :  { %305 = vst.msk [vmem:[#allocation2] sm:$0xff] %vm27_vm0, %v303_v7 }
 0x30b   :  { %v313_v8 = vld [vmem:[#allocation2 + $0x8] sm:$0xff] }
 0x30c   :  { %v312_v9 = vld [vmem:[#allocation2] sm:$0xff]  ;;  %v315_v10 = vadd.f32 %v313_v8, %v512_v1 }
 0x30d   :  { %v314_v11 = vadd.f32 %v312_v9, %v507_v0 }
 0x30e   :  { %317 = vst.msk [vmem:[#allocation4 + $0x8] sm:$0xff] %vm27_vm0, %v315_v10 }
 0x30f   :  { %316 = vst.msk [vmem:[#allocation4] sm:$0xff] %vm27_vm0, %v314_v11 }
 0x310   :  { %457 = shalt.err (!%p454_p4)
}
 0x311   :  { %s458_s24 = scalar_lea.hbm %s619_s5, 256 }
 0x312   :  { %p459_p5 = scmp.ne.s32.totalorder %s619_s5, %s458_s24  ;;  %p462_p6 = scmp.lt.u32.totalorder %s458_s24, %s619_s5 }
 0x314   :  { %p464_p7 = pnand %p462_p6, %p459_p5 }
 0x316   :  { %467 = shalt.err (!%p464_p7)
}
 0x317   :  { %s472_s29 = smov 128   ;;  %s473_s30 = smov 8  }
 0x318   :  { %329 = dma.vmem_to_hbm [thread:$0]  %s324_s21, 256, %s619_s5, [#allocation5], %s472_s29, %s472_s29, %s473_s30  }
 0x319   :  { %468 = dma.done.wait [#allocation5], 256  }
 0x31a   :  { %469 = vsyncadd [#allocation5], 4294967040 }
 0x31b   :  { %333 = vsyncpa [#allocation5], 1 }

</bundles_post_ra>
